<compile_context>
chip_gen: v7x
topology: tpu7x:2x2x1
jax: 0.10.0
libtpu: 0.0.40
codegen_flags: <defaults>
</compile_context>

<pallas_src>
import jax
import jax.numpy as jnp
import numpy as np
from jax.experimental import pallas as pl
from jax.experimental.pallas import tpu as pltpu


# --------------------------------------------------------------------------
# small config (mirrors SiglipVisionConfig, scaled down but layout-friendly)
# --------------------------------------------------------------------------
HIDDEN = 128                              # hidden_size (lane-dense output)
CHANNELS = 3                              # num_channels (Conv2d in_channels)
IMAGE = 32                                # image_size
PATCH = 8                                 # patch_size
NUM_PATCHES = (IMAGE // PATCH) ** 2       # 16 patches (sublane-dense)
BATCH = 2
CPP = CHANNELS * PATCH * PATCH            # 192 = flattened patch length


# --------------------------------------------------------------------------
# Pallas kernel: one M block (rb batch elements worth of patch rows) per step
# --------------------------------------------------------------------------
def _embed_kernel(p_ref, w_ref, addend_ref, o_ref):
    """(bm, CPP) bf16 @ (CPP, D) bf16 on the MXU (f32 acc), then add the
    pre-tiled f32 (conv bias + positional embedding) addend."""
    o_ref[...] = (
        jnp.dot(p_ref[...], w_ref[...], preferred_element_type=jnp.float32)
        + addend_ref[...]
    )


# --------------------------------------------------------------------------
# wrapper
# --------------------------------------------------------------------------
def siglip_vision_embeddings(pixel_values, patch_w, patch_b, pos_emb):
    """pixel_values: [B, C, H, W] f32 (NCHW, like PyTorch).
       patch_w: (C*P*P, D) — Conv2d weight (D, C, P, P) flattened + transposed.
       patch_b: (D,) conv bias.  pos_emb: (N, D) position-embedding table."""
    B, C, H, W = pixel_values.shape
    P = PATCH
    # 'valid' strided conv would silently drop remainders; SigLIP requires none.
    assert H % P == 0 and W % P == 0, "image size must be divisible by patch size"
    Hp, Wp = H // P, W // P
    N = Hp * Wp
    cpp = C * P * P
    D = patch_w.shape[1]

    # Layout glue: non-overlapping patch extraction -> (B*N, C*P*P) with inner
    # order (c, kh, kw) so the strided 'valid' conv is a plain matmul.  This is
    # the operand marked for input fusion below so XLA can fold the rearrange
    # (+ bf16 cast) into the kernel's input DMA rather than a separate HBM pass.
    patches = (pixel_values
               .reshape(B, C, Hp, P, Wp, P)
               .transpose(0, 2, 4, 1, 3, 5)
               .reshape(B * N, cpp)
               .astype(jnp.bfloat16))

    w_bf16 = patch_w.astype(jnp.bfloat16)

    # Rows per grid step: merge whole batch elements into the matmul M dim,
    # targeting ~256 rows (fills a v6e/v7x 256x256 MXU; >=128 also fills v5e).
    rb = max(1, min(B, 256 // max(N, 1)))
    while B % rb:                          # keep every block full
        rb -= 1
    bm = rb * N                            # rows per block (toy: 2*16 = 32)

    # Fold the conv bias into the positional addend (exact) and tile it once to
    # the block's row count; the same (bm, D) f32 tile is reused by every block.
    addend = jnp.tile(pos_emb + patch_b[None, :], (rb, 1)).astype(jnp.float32)

    out2d = pl.pallas_call(
        _embed_kernel,
        out_shape=jax.ShapeDtypeStruct((B * N, D), jnp.float32),
        grid=(B // rb,),
        in_specs=[
            pl.BlockSpec((bm, cpp), lambda m: (m, 0)),    # patch rows (per block)
            pl.BlockSpec((cpp, D), lambda m: (0, 0)),     # weight (VMEM-resident)
            pl.BlockSpec((bm, D), lambda m: (0, 0)),      # bias+pos (VMEM-resident)
        ],
        out_specs=pl.BlockSpec((bm, D), lambda m: (m, 0)),
        compiler_params=pltpu.CompilerParams(
            dimension_semantics=("parallel",),
            # Let XLA fuse the patch rearrange/cast into the input DMA.
            allow_input_fusion=[True, False, False],
        ),
    )(patches, w_bf16, addend)

    return out2d.reshape(B, N, D)


# --------------------------------------------------------------------------
# pure-JAX reference using a real strided conv (torch Conv2d semantics, f32)
# --------------------------------------------------------------------------
def reference_forward(pixel_values, conv_w, conv_b, pos_emb):
    out = jax.lax.conv_general_dilated(
        pixel_values, conv_w,
        window_strides=(PATCH, PATCH),
        padding="VALID",
        dimension_numbers=("NCHW", "OIHW", "NCHW"))           # (B, D, Hp, Wp)
    out = out + conv_b[None, :, None, None]
    B, D, Hp, Wp = out.shape
    emb = out.reshape(B, D, Hp * Wp).transpose(0, 2, 1)       # flatten(2).transpose(1,2)
    return emb + pos_emb[None]


# --------------------------------------------------------------------------
if __name__ == "__main__":
    key = jax.random.PRNGKey(0)
    k1, k2, k3, k4 = jax.random.split(key, 4)

    # Conv2d weight (D, C, P, P) and bias, Embedding table (N, D) — synthetic.
    conv_w = (jax.random.normal(k1, (HIDDEN, CHANNELS, PATCH, PATCH), jnp.float32)
              * 0.02).astype(jnp.float32)
    conv_b = (jax.random.normal(k2, (HIDDEN,), jnp.float32) * 0.02).astype(jnp.float32)
    pos_emb = (jax.random.normal(k3, (NUM_PATCHES, HIDDEN), jnp.float32)
               * 0.02).astype(jnp.float32)
    pixel_values = jax.random.normal(
        k4, (BATCH, CHANNELS, IMAGE, IMAGE), jnp.float32)

    # Flatten OIHW -> (D, C*P*P) then transpose to (C*P*P, D) matmul form;
    # flattened inner order (c, kh, kw) matches the patch-vector order above.
    patch_w = conv_w.reshape(HIDDEN, CPP).T

    fwd = jax.jit(siglip_vision_embeddings)
    out = jax.block_until_ready(fwd(pixel_values, patch_w, conv_b, pos_emb))

    ref = reference_forward(pixel_values, conv_w, conv_b, pos_emb)
    # bf16 MXU inputs (f32 accumulation) -> loosen tolerance vs. the f32 reference.
    np.testing.assert_allclose(np.asarray(out), np.asarray(ref),
                               rtol=2e-2, atol=2e-2)

    assert out.shape == (BATCH, NUM_PATCHES, HIDDEN)
    print("KERNEL_OK")
</pallas_src>

<mosaic_0001>
module attributes {stable_mosaic.version = 11 : i64} {
  func.func @_embed_kernel(%arg0: i32, %arg1: memref<32x192xbf16, #tpu.memory_space<vmem>>, %arg2: memref<192x128xbf16, #tpu.memory_space<vmem>>, %arg3: memref<32x128xf32, #tpu.memory_space<vmem>>, %arg4: memref<32x128xf32, #tpu.memory_space<vmem>>) attributes {dimension_semantics = [#tpu.dimension_semantics<parallel>], iteration_bounds = array<i64: 1>, scalar_prefetch = 0 : i64, scratch_operands = 0 : i64, tpu.core_type = #tpu.core_type<tc>, window_params = [{transform_indices = @transform_0, window_bounds = array<i64: 32, 192>}, {pipeline_mode = #tpu.pipeline_mode<synchronous>, transform_indices = @transform_1, window_bounds = array<i64: 192, 128>}, {pipeline_mode = #tpu.pipeline_mode<synchronous>, transform_indices = @transform_2, window_bounds = array<i64: 32, 128>}, {transform_indices = @transform_3, window_bounds = array<i64: 32, 128>}]} {
    %c0 = arith.constant 0 : index
    %c0_0 = arith.constant 0 : index
    %0 = vector.load %arg1[%c0, %c0_0] : memref<32x192xbf16, #tpu.memory_space<vmem>>, vector<32x192xbf16>
    %c0_1 = arith.constant 0 : index
    %c0_2 = arith.constant 0 : index
    %1 = vector.load %arg2[%c0_1, %c0_2] : memref<192x128xbf16, #tpu.memory_space<vmem>>, vector<192x128xbf16>
    %cst = arith.constant dense<0.000000e+00> : vector<32x128xf32>
    %2 = tpu.matmul %0, %1, %cst {dimension_numbers = #tpu.dot_dimension_numbers<[1], [0], [0], [1], [0, 0, 1, 1], [], []>} : vector<32x192xbf16>, vector<192x128xbf16>, vector<32x128xf32> -> vector<32x128xf32>
    %c0_3 = arith.constant 0 : index
    %c0_4 = arith.constant 0 : index
    %3 = vector.load %arg3[%c0_3, %c0_4] : memref<32x128xf32, #tpu.memory_space<vmem>>, vector<32x128xf32>
    %4 = arith.addf %2, %3 : vector<32x128xf32>
    %c0_5 = arith.constant 0 : index
    %c0_6 = arith.constant 0 : index
    %5 = vector.load %arg4[%c0_5, %c0_6] : memref<32x128xf32, #tpu.memory_space<vmem>>, vector<32x128xf32>
    tpu.vector_store %arg4[%c0_5, %c0_6], %4 {strides = array<i32>} : memref<32x128xf32, #tpu.memory_space<vmem>>, vector<32x128xf32>,
    return
  }
  func.func @transform_0(%arg0: i32) -> (i32, i32) {
    %c0_i32 = arith.constant 0 : i32
    %c0_i32_0 = arith.constant 0 : i32
    return %arg0, %c0_i32 : i32, i32
  }
  func.func @transform_1(%arg0: i32) -> (i32, i32) {
    %c0_i32 = arith.constant 0 : i32
    %c0_i32_0 = arith.constant 0 : i32
    %c0_i32_1 = arith.constant 0 : i32
    return %c0_i32, %c0_i32_0 : i32, i32
  }
  func.func @transform_2(%arg0: i32) -> (i32, i32) {
    %c0_i32 = arith.constant 0 : i32
    %c0_i32_0 = arith.constant 0 : i32
    %c0_i32_1 = arith.constant 0 : i32
    return %c0_i32, %c0_i32_0 : i32, i32
  }
  func.func @transform_3(%arg0: i32) -> (i32, i32) {
    %c0_i32 = arith.constant 0 : i32
    %c0_i32_0 = arith.constant 0 : i32
    return %arg0, %c0_i32 : i32, i32
  }
}

</mosaic_0001>

<bundles_post_ra>
// kernel: siglip_vision_embeddings.1
= control target key start
LH: loop header
LB: loop body
LE: loop exit
PB: predicated region body
PF: predicated region fallthrough
CT: control target
= control target key end

     0   :  { %v302_v1 = vmov 0   ;;  %vm138_vm0 = vcmask 523264   ;;  %s398_s0 = inlined_call_operand.vmem [shape: bf16[32,192], index: 0, kind: input, shape index: {}]   ;;  %s399_s1 = inlined_call_operand.vmem [shape: bf16[192,128], index: 1, kind: input, shape index: {}]   ;;  %s400_s2 = inlined_call_operand.vmem [shape: f32[32,128], index: 2, kind: input, shape index: {}]   ;;  %s401_s3 = inlined_call_operand.hbm [shape: f32[32,128], index: 3, kind: output, shape index: {}]  }
   0x1   :  { %v260_v0 = vld [vmem:[%s399_s1] sm:$0xff]   ;;  %145 = vmatprep.subr.bf16.mxu0 %v302_v1  ;;  %232 = vmatprep.subr.bf16.mxu1 %v302_v1  ;;  %v261_v2 = vld [vmem:[%s399_s1 + $0x8] sm:$0xff]   ;;  %v262_v3 = vld [vmem:[%s399_s1 + $0x10] sm:$0xff]  }
   0x2   :  { %146 = vmatpush1.bf16.msra.mxu0 %v260_v0  ;;  %244 = vmatpush1.bf16.msra.mxu1 %v260_v0  ;;  %v263_v4 = vld [vmem:[%s399_s1 + $0x18] sm:$0xff]   ;;  %v274_v5 = vld [vmem:[%s398_s0 + $0x4] ss:$8 sps:$4 sm:$0xff]  }
   0x3   :  { %147 = vmatprep.subr.bf16.mxu0 %v302_v1  ;;  %233 = vmatprep.subr.bf16.mxu1 %v302_v1  ;;  %v264_v6 = vld [vmem:[%s399_s1 + $0x20] sm:$0xff]   ;;  %v277_v7 = vld [vmem:[%s398_s0 + $0x14] ss:$8 sps:$4 sm:$0xff]  }
   0x6   :  { %148 = vmatpush1.bf16.msra.mxu0 %v261_v2  ;;  %245 = vmatpush1.bf16.msra.mxu1 %v261_v2 }
   0x7   :  { %149 = vmatprep.subr.bf16.mxu0 %v302_v1  ;;  %234 = vmatprep.subr.bf16.mxu1 %v302_v1 }
   0xa   :  { %150 = vmatpush1.bf16.msra.mxu0 %v262_v3  ;;  %246 = vmatpush1.bf16.msra.mxu1 %v262_v3 }
   0xb   :  { %151 = vmatprep.subr.bf16.mxu0 %v302_v1  ;;  %235 = vmatprep.subr.bf16.mxu1 %v302_v1 }
   0xe   :  { %152 = vmatpush1.bf16.msra.mxu0 %v263_v4  ;;  %247 = vmatpush1.bf16.msra.mxu1 %v263_v4 }
   0xf   :  { %153 = vmatprep.subr.bf16.mxu0 %v302_v1  ;;  %236 = vmatprep.subr.bf16.mxu1 %v302_v1 }
  0x10   :  { %8 = vsyncpa [#allocation3], 0  ;;  %230 = vmatprep.mubr.msk.bf16.mxu0 %vm138_vm0, %v274_v5  ;;  %231 = vmatprep.mubr.msk.bf16.mxu1 %vm138_vm0, %v277_v7  ;;  %v265_v8 = vld [vmem:[%s399_s1 + $0x28] sm:$0xff]   ;;  %v266_v9 = vld [vmem:[%s399_s1 + $0x30] sm:$0xff]   ;;  %s303_s20 = smov [#allocation2]  }
  0x11   :  { %v267_v10 = vld [vmem:[%s399_s1 + $0x38] sm:$0xff]   ;;  %v268_v11 = vld [vmem:[%s399_s1 + $0x40] sm:$0xff]   ;;  %v269_v12 = vld [vmem:[%s399_s1 + $0x48] sm:$0xff]   ;;  %s203_s21 = sshll.u32 %s303_s20, 4  ;;  %s204_s21 = int_to_ptr.vmem [resolvable:$true] %s203_s21 }
  0x12   :  { %154 = vmatpush1.bf16.msra.mxu0 %v264_v6  ;;  %248 = vmatpush1.bf16.msra.mxu1 %v264_v6  ;;  %v270_v13 = vld [vmem:[%s399_s1 + $0x50] sm:$0xff]   ;;  %v271_v14 = vld [vmem:[%s399_s1 + $0x58] sm:$0xff]   ;;  %v272_v15 = vld [vmem:[%s398_s0] ss:$8 sps:$4 sm:$0xff]   ;;  %s278_s25 = scalar_lea.vmem %s204_s21, 512  ;;  %p283_p1 = scmp.lt.s32.totalorder %s204_s21, %s204_s21 }
  0x13   :  { %155 = vmatprep.subr.bf16.mxu0 %v302_v1  ;;  %237 = vmatprep.subr.bf16.mxu1 %v302_v1  ;;  %v275_v16 = vld [vmem:[%s398_s0 + $0x10] ss:$8 sps:$4 sm:$0xff]   ;;  %v44_v17 = vld [vmem:[%s400_s2] sm:$0xff]  ;;  %v45_v21 = vld [vmem:[%s400_s2 + $0x8] sm:$0xff]  ;;  %p279_p0 = scmp.ne.s32.totalorder %s204_s21, %s278_s25  ;;  %p284_p2 = scmp.lt.s32.totalorder %s278_s25, %s278_s25 }
  0x14   :  { %v46_v18 = vld [vmem:[%s400_s2 + $0x10] sm:$0xff]  ;;  %v47_v22 = vld [vmem:[%s400_s2 + $0x18] sm:$0xff] }
  0x15   :  { %p285_p3 = por %p284_p2, %p283_p1 }
  0x16   :  { %156 = vmatpush1.bf16.msra.mxu0 %v265_v8  ;;  %249 = vmatpush1.bf16.msra.mxu1 %v265_v8 }
  0x17   :  { %157 = vmatprep.subr.bf16.mxu0 %v302_v1  ;;  %238 = vmatprep.subr.bf16.mxu1 %v302_v1  ;;  %p286_p4 = pnand %p285_p3, %p279_p0 }
  0x1a   :  { %158 = vmatpush1.bf16.msra.mxu0 %v266_v9  ;;  %250 = vmatpush1.bf16.msra.mxu1 %v266_v9 }
  0x1b   :  { %159 = vmatprep.subr.bf16.mxu0 %v302_v1  ;;  %239 = vmatprep.subr.bf16.mxu1 %v302_v1 }
  0x1e   :  { %160 = vmatpush1.bf16.msra.mxu0 %v267_v10  ;;  %251 = vmatpush1.bf16.msra.mxu1 %v267_v10 }
  0x1f   :  { %161 = vmatprep.subr.bf16.mxu0 %v302_v1  ;;  %240 = vmatprep.subr.bf16.mxu1 %v302_v1 }
  0x22   :  { %162 = vmatpush1.bf16.msra.mxu0 %v268_v11  ;;  %252 = vmatpush1.bf16.msra.mxu1 %v268_v11 }
  0x23   :  { %163 = vmatprep.subr.bf16.mxu0 %v302_v1  ;;  %241 = vmatprep.subr.bf16.mxu1 %v302_v1 }
  0x26   :  { %164 = vmatpush1.bf16.msra.mxu0 %v269_v12  ;;  %253 = vmatpush1.bf16.msra.mxu1 %v269_v12 }
  0x27   :  { %165 = vmatprep.subr.bf16.mxu0 %v302_v1  ;;  %242 = vmatprep.subr.bf16.mxu1 %v302_v1 }
  0x2a   :  { %166 = vmatpush1.bf16.msra.mxu0 %v270_v13  ;;  %254 = vmatpush1.bf16.msra.mxu1 %v270_v13 }
  0x2b   :  { %167 = vmatprep.subr.bf16.mxu0 %v302_v1  ;;  %243 = vmatprep.subr.bf16.mxu1 %v302_v1 }
  0x2e   :  { %168 = vmatpush1.bf16.msra.mxu0 %v271_v14  ;;  %255 = vmatpush1.bf16.msra.mxu1 %v271_v14 }
  0x31   :  { %178 = vmatmul.mubr.bf16.vlgmr.msra.gmra.mrb[0].mxu0 %v272_v15  ;;  %186 = vmatmul.mubr.bf16.vlgmr.msra.gmra.mrb[0].mxu1 %v275_v16 }
 0x104   :  { %v179_v19 = vpop.f32.mrb[0].mxu0  ;;  %v187_v20 = vpop.f32.mrb[0].mxu1 }
 0x105   :  { %v180_v23 = vadd.f32 %v179_v19, %v44_v17  ;;  %v188_v24 = vadd.f32 %v187_v20, %v46_v18  ;;  %v181_v25 = vpop.f32.mrb[1].mxu0  ;;  %v189_v26 = vpop.f32.mrb[1].mxu1 }
 0x106   :  { %v182_v27 = vpop.f32.mrb[2].mxu0  ;;  %v190_v28 = vpop.f32.mrb[2].mxu1 }
 0x107   :  { %194 = vst [vmem:[#allocation2] sm:$0xff] %v180_v23  ;;  %196 = vst [vmem:[#allocation2 + $0x10] sm:$0xff] %v188_v24  ;;  %v183_v29 = vadd.f32 %v182_v27, %v45_v21  ;;  %v191_v30 = vadd.f32 %v190_v28, %v47_v22  ;;  %v184_v31 = vpop.f32.mrb[3].mxu0  ;;  %v192_v32 = vpop.f32.mrb[3].mxu1 }
 0x109   :  { %195 = vst [vmem:[#allocation2 + $0x8] sm:$0xff] %v183_v29  ;;  %197 = vst [vmem:[#allocation2 + $0x18] sm:$0xff] %v191_v30 }
 0x10a   :  { %289 = shalt.err (!%p286_p4)
}
 0x10b   :  { %s290_s27 = scalar_lea.hbm %s401_s3, 512 }
 0x10c   :  { %p291_p5 = scmp.ne.s32.totalorder %s401_s3, %s290_s27  ;;  %p294_p6 = scmp.lt.u32.totalorder %s290_s27, %s401_s3 }
 0x10e   :  { %p296_p7 = pnand %p294_p6, %p291_p5 }
 0x110   :  { %299 = shalt.err (!%p296_p7)
}
 0x111   :  { %s304_s5 = smov 128   ;;  %s305_s6 = smov 8  }
 0x112   :  { %209 = dma.vmem_to_hbm [thread:$0]  %s204_s21, 512, %s401_s3, [#allocation3], %s304_s5, %s304_s5, %s305_s6  }
 0x113   :  { %300 = dma.done.wait [#allocation3], 512  }
 0x114   :  { %301 = vsyncadd [#allocation3], 4294966784 }
 0x115   :  { %213 = vsyncpa [#allocation3], 1 }

</bundles_post_ra>
